<compile_context>
chip_gen: v7x
topology: tpu7x:2x2x1
jax: 0.10.0
libtpu: 0.0.40
codegen_flags: <defaults>
</compile_context>

<pallas_src>
import functools

import jax
import jax.numpy as jnp
from jax import lax
from jax.experimental import pallas as pl
from jax.experimental.pallas import tpu as pltpu


_VMEM_LIMIT_CACHE = [None]


def _vmem_limit():
    """Generation-dependent scoped-VMEM limit (~75% of physical, capped)."""
    if _VMEM_LIMIT_CACHE[0] is None:
        try:
            cap = pltpu.get_tpu_info().vmem_capacity_bytes
        except Exception:
            cap = 64 * 1024 * 1024
        _VMEM_LIMIT_CACHE[0] = max(32 * 1024 * 1024,
                                   min(int(cap) * 3 // 4, 96 * 1024 * 1024))
    return _VMEM_LIMIT_CACHE[0]


def _pick_tile(dim, candidates):
    """Largest candidate tile that exactly divides dim, else the full dim."""
    for t in candidates:
        if dim >= t and dim % t == 0:
            return t
    return dim


# ------------------------- Tiled linear (x @ W [+ b]) ----------------------- #

def _matmul_kernel(x_ref, w_ref, o_ref, acc_ref):
    @pl.when(pl.program_id(2) == 0)
    def _():
        acc_ref[...] = jnp.zeros_like(acc_ref)

    acc_ref[...] += jnp.dot(x_ref[...], w_ref[...],
                            preferred_element_type=jnp.float32)

    @pl.when(pl.program_id(2) == pl.num_programs(2) - 1)
    def _():
        o_ref[...] = acc_ref[...].astype(o_ref.dtype)


def _matmul_bias_kernel(x_ref, w_ref, b_ref, o_ref, acc_ref):
    @pl.when(pl.program_id(2) == 0)
    def _():
        acc_ref[...] = jnp.zeros_like(acc_ref)

    acc_ref[...] += jnp.dot(x_ref[...], w_ref[...],
                            preferred_element_type=jnp.float32)

    @pl.when(pl.program_id(2) == pl.num_programs(2) - 1)
    def _():
        o_ref[...] = (acc_ref[...] + b_ref[...].astype(jnp.float32)
                      ).astype(o_ref.dtype)


def linear(x2d, w, b=None, out_dtype=None):
    """x2d: (M, K), w: (K, Nout) (already transposed vs. torch's (out, in)).

    Operands should be pre-cast (e.g. to bf16) in the caller; the kernel only
    accumulates in f32 via preferred_element_type.
    """
    M, K = x2d.shape
    Kw, Nout = w.shape
    assert K == Kw
    out_dtype = out_dtype or x2d.dtype

    # Pad rows to a multiple of 8 so the M tile is always (8,128)-legal.
    Mp = ((M + 7) // 8) * 8
    if Mp != M:
        x2d = jnp.pad(x2d, ((0, Mp - M), (0, 0)))

    tm = _pick_tile(Mp, (512, 256, 128, 64, 32, 16, 8))
    tn = _pick_tile(Nout, (512, 256, 128))
    tk = _pick_tile(K, (512, 256, 128))
    # Megacore (v7x): make sure the parallel axes expose >= 2 blocks.
    if Mp // tm == 1 and Nout // tn == 1 and Mp % 16 == 0:
        tm = Mp // 2
    grid = (pl.cdiv(Mp, tm), pl.cdiv(Nout, tn), pl.cdiv(K, tk))

    itemsize = lambda a: jnp.dtype(a.dtype).itemsize
    cost = pl.CostEstimate(
        flops=2 * Mp * K * Nout,
        transcendentals=0,
        bytes_accessed=(Mp * K * itemsize(x2d) + K * Nout * itemsize(w)
                        + Mp * Nout * jnp.dtype(out_dtype).itemsize),
    )
    cparams = pltpu.CompilerParams(
        dimension_semantics=("parallel", "parallel", "arbitrary"),
        vmem_limit_bytes=_vmem_limit(),
    )

    x_spec = pl.BlockSpec((tm, tk), lambda i, j, k: (i, k))
    w_spec = pl.BlockSpec((tk, tn), lambda i, j, k: (k, j))
    o_spec = pl.BlockSpec((tm, tn), lambda i, j, k: (i, j))
    scratch = [pltpu.VMEM((tm, tn), jnp.float32)]
    out_shape = jax.ShapeDtypeStruct((Mp, Nout), out_dtype)

    if b is None:
        out = pl.pallas_call(
            _matmul_kernel, out_shape=out_shape, grid=grid,
            in_specs=[x_spec, w_spec], out_specs=o_spec,
            scratch_shapes=scratch, compiler_params=cparams,
            cost_estimate=cost,
        )(x2d, w)
    else:
        b2d = b.reshape(1, Nout)
        b_spec = pl.BlockSpec((1, tn), lambda i, j, k: (0, j))  # stays resident
        out = pl.pallas_call(
            _matmul_bias_kernel, out_shape=out_shape, grid=grid,
            in_specs=[x_spec, w_spec, b_spec], out_specs=o_spec,
            scratch_shapes=scratch, compiler_params=cparams,
            cost_estimate=cost,
        )(x2d, w, b2d)

    return out[:M] if Mp != M else out


# ------------------ Fused SimA attention + output projection ---------------- #

def _sima_attn_proj_kernel(qkv_ref, wp_ref, bp_ref, o_ref, heads_ref, *,
                           num_heads, head_dim, n_lt_d):
    # qkv_ref: (N, 3C) for one batch element, columns laid out as
    #   q = [h*d, (h+1)*d), k = [C + h*d, ...), v = [2C + h*d, ...).
    # wp_ref: (C, C) resident projection weight, bp_ref: (1, C) bias.
    # heads_ref: (N, C) f32 VMEM scratch holding the merged head outputs.
    # o_ref: (N, C) final output block, already in (B, N, C) layout.
    C = num_heads * head_dim

    # F.normalize(p=1.0, dim=-2) is per-column over tokens, so one slab-wide
    # column sum + reciprocal per q/k is identical to per-head normalization.
    inv_q = pl.reciprocal(
        jnp.maximum(jnp.sum(jnp.abs(qkv_ref[:, :C].astype(jnp.float32)),
                            axis=0, keepdims=True), 1e-12),
        approx=True)
    inv_k = pl.reciprocal(
        jnp.maximum(jnp.sum(jnp.abs(qkv_ref[:, C:2 * C].astype(jnp.float32)),
                            axis=0, keepdims=True), 1e-12),
        approx=True)

    for h in range(num_heads):
        lo = h * head_dim
        hi = lo + head_dim
        q = qkv_ref[:, lo:hi].astype(jnp.float32) * inv_q[:, lo:hi]
        k = qkv_ref[:, C + lo:C + hi].astype(jnp.float32) * inv_k[:, lo:hi]
        v = qkv_ref[:, 2 * C + lo:2 * C + hi].astype(jnp.float32)

        if n_lt_d:
            # (q @ k^T) @ v
            attn = lax.dot_general(q, k, (((1,), (1,)), ((), ())),
                                   preferred_element_type=jnp.float32)  # (N, N)
            out_h = jnp.dot(attn, v, preferred_element_type=jnp.float32)
        else:
            # q @ (k^T @ v)
            kv = lax.dot_general(k, v, (((0,), (0,)), ((), ())),
                                 preferred_element_type=jnp.float32)    # (d, d)
            out_h = jnp.dot(q, kv, preferred_element_type=jnp.float32)

        heads_ref[:, lo:hi] = out_h

    # Fused output projection: one well-shaped (N,C)x(C,C) MXU matmul + bias,
    # single lane-dense (N, C) store.
    proj = jnp.dot(heads_ref[...].astype(wp_ref.dtype), wp_ref[...],
                   preferred_element_type=jnp.float32)
    o_ref[...] = (proj + bp_ref[...].astype(jnp.float32)).astype(o_ref.dtype)


def sima_attention_proj(qkv, w_proj, b_proj, num_heads, out_dtype):
    """qkv: (B, N, 3C) activation, w_proj: (C, C), b_proj: (C,) -> (B, N, C)."""
    B, N, C3 = qkv.shape
    C = C3 // 3
    d = C // num_heads
    n_lt_d = N < d

    if n_lt_d:
        head_flops = num_heads * (2 * N * N * d + 2 * N * N * d)
    else:
        head_flops = num_heads * (2 * N * d * d + 2 * N * d * d)
    cost = pl.CostEstimate(
        flops=B * (head_flops + 2 * N * C * C),
        transcendentals=2 * C,  # the two approx reciprocals per batch step
        bytes_accessed=(B * (N * C3 * jnp.dtype(qkv.dtype).itemsize
                             + N * C * jnp.dtype(out_dtype).itemsize)
                        + C * C * jnp.dtype(w_proj.dtype).itemsize
                        + C * jnp.dtype(b_proj.dtype).itemsize),
    )

    kernel = functools.partial(_sima_attn_proj_kernel, num_heads=num_heads,
                               head_dim=d, n_lt_d=n_lt_d)
    return pl.pallas_call(
        kernel,
        out_shape=jax.ShapeDtypeStruct((B, N, C), out_dtype),
        grid=(B,),
        in_specs=[
            pl.BlockSpec((None, N, C3), lambda b: (b, 0, 0)),
            pl.BlockSpec((C, C), lambda b: (0, 0)),   # resident weight
            pl.BlockSpec((1, C), lambda b: (0, 0)),   # resident bias
        ],
        out_specs=pl.BlockSpec((None, N, C), lambda b: (b, 0, 0)),
        scratch_shapes=[pltpu.VMEM((N, C), jnp.float32)],
        compiler_params=pltpu.CompilerParams(
            dimension_semantics=("parallel",),
            vmem_limit_bytes=_vmem_limit(),
        ),
        cost_estimate=cost,
    )(qkv, w_proj, b_proj.reshape(1, C))


# ------------------------------- Full forward ------------------------------- #

def sima_forward(x, params, num_heads):
    B, N, C = x.shape

    # bf16 MXU operands (f32 accumulation inside the kernels).  Gate behind a
    # flag if strict f32 parity with PyTorch is ever required.
    x_bf = x.astype(jnp.bfloat16)
    w_qkv_bf = params["w_qkv"].astype(jnp.bfloat16)
    w_proj_bf = params["w_proj"].astype(jnp.bfloat16)

    # qkv = Linear(C, 3C, bias=False); bf16 activation to halve the HBM
    # round-trip of the (B, N, 3C) intermediate.
    qkv = linear(x_bf.reshape(B * N, C), w_qkv_bf, out_dtype=jnp.bfloat16)
    qkv = qkv.reshape(B, N, 3 * C)  # pure reshape, no transpose

    # Attention reads q/k/v straight from the qkv columns, keeps w_proj/b_proj
    # resident, and writes the projected (B, N, C) output directly -> no
    # permute(2,0,3,1,4)/transpose(1,2) round trips and no third pallas_call.
    # attn_drop / proj_drop have p=0.0 -> identity.
    out = sima_attention_proj(qkv, w_proj_bf, params["b_proj"], num_heads,
                              out_dtype=x.dtype)
    return out


# ------------------------------ Pure-JAX reference --------------------------- #

def sima_reference(x, params, num_heads):
    B, N, C = x.shape
    d = C // num_heads
    hi = lax.Precision.HIGHEST
    qkv = jnp.matmul(x.reshape(B * N, C), params["w_qkv"], precision=hi)
    qkv = qkv.reshape(B, N, 3, num_heads, d).transpose(2, 0, 3, 1, 4)
    q, k, v = qkv[0], qkv[1], qkv[2]
    q = q / jnp.maximum(jnp.sum(jnp.abs(q), axis=-2, keepdims=True), 1e-12)
    k = k / jnp.maximum(jnp.sum(jnp.abs(k), axis=-2, keepdims=True), 1e-12)
    if N < d:
        out = jnp.matmul(jnp.matmul(q, jnp.swapaxes(k, -2, -1), precision=hi),
                         v, precision=hi)
    else:
        out = jnp.matmul(q, jnp.matmul(jnp.swapaxes(k, -2, -1), v, precision=hi),
                         precision=hi)
    out = out.transpose(0, 2, 1, 3).reshape(B * N, C)
    out = jnp.matmul(out, params["w_proj"], precision=hi) + params["b_proj"]
    return out.reshape(B, N, C)


# ----------------------------------- Main ------------------------------------ #

if __name__ == "__main__":
    key = jax.random.PRNGKey(0)
    B, N, C, H = 2, 16, 64, 8  # head_dim d = 8; N >= d -> "else" branch in forward
    kx, kw1, kw2, kb = jax.random.split(key, 4)

    x = jax.random.normal(kx, (B, N, C), jnp.float32)
    params = {
        # torch Linear stores (out, in); we store the transposed (in, out) so
        # the kernels do x @ W directly.
        "w_qkv": 0.02 * jax.random.normal(kw1, (C, 3 * C), jnp.float32),
        "w_proj": 0.02 * jax.random.normal(kw2, (C, C), jnp.float32),
        "b_proj": 0.02 * jax.random.normal(kb, (C,), jnp.float32),
    }

    out = jax.block_until_ready(sima_forward(x, params, H))
    ref = jax.block_until_ready(sima_reference(x, params, H))

    assert out.shape == (B, N, C), out.shape
    assert jnp.allclose(out, ref, rtol=2e-2, atol=2e-2), float(
        jnp.max(jnp.abs(out - ref))
    )
    print("KERNEL_OK")
</pallas_src>

<mosaic_0001>
module attributes {stable_mosaic.version = 11 : i64} {
  func.func @_matmul_kernel(%arg0: i32, %arg1: i32, %arg2: i32, %arg3: memref<16x64xbf16, #tpu.memory_space<vmem>>, %arg4: memref<64x192xbf16, #tpu.memory_space<vmem>>, %arg5: memref<16x192xbf16, #tpu.memory_space<vmem>>, %arg6: memref<16x192xf32, #tpu.memory_space<vmem>>) attributes {dimension_semantics = [#tpu.dimension_semantics<parallel>, #tpu.dimension_semantics<parallel>, #tpu.dimension_semantics<arbitrary>], iteration_bounds = array<i64: 2, 1, 1>, scalar_prefetch = 0 : i64, scratch_operands = 1 : i64, tpu.core_type = #tpu.core_type<tc>, window_params = [{transform_indices = @transform_0, window_bounds = array<i64: 16, 64>}, {transform_indices = @transform_1, window_bounds = array<i64: 64, 192>}, {transform_indices = @transform_2, window_bounds = array<i64: 16, 192>}]} {
    %c0_i32 = arith.constant 0 : i32
    %0 = arith.cmpi eq, %arg2, %c0_i32 : i32
    %1 = arith.extui %0 : i1 to i32
    %c0_i32_0 = arith.constant 0 : i32
    %2 = arith.cmpi ne, %1, %c0_i32_0 : i32
    scf.if %2 {
      %cst_10 = arith.constant 0.000000e+00 : f32
      %12 = vector.broadcast %cst_10 : f32 to vector<16x192xf32>
      %c0_11 = arith.constant 0 : index
      %c0_12 = arith.constant 0 : index
      %13 = vector.load %arg6[%c0_11, %c0_12] : memref<16x192xf32, #tpu.memory_space<vmem>>, vector<16x192xf32>
      tpu.vector_store %arg6[%c0_11, %c0_12], %12 {strides = array<i32>} : memref<16x192xf32, #tpu.memory_space<vmem>>, vector<16x192xf32>,
    } else {
    }
    %c0 = arith.constant 0 : index
    %c0_1 = arith.constant 0 : index
    %3 = vector.load %arg6[%c0, %c0_1] : memref<16x192xf32, #tpu.memory_space<vmem>>, vector<16x192xf32>
    %c0_2 = arith.constant 0 : index
    %c0_3 = arith.constant 0 : index
    %4 = vector.load %arg3[%c0_2, %c0_3] : memref<16x64xbf16, #tpu.memory_space<vmem>>, vector<16x64xbf16>
    %c0_4 = arith.constant 0 : index
    %c0_5 = arith.constant 0 : index
    %5 = vector.load %arg4[%c0_4, %c0_5] : memref<64x192xbf16, #tpu.memory_space<vmem>>, vector<64x192xbf16>
    %cst = arith.constant dense<0.000000e+00> : vector<16x192xf32>
    %6 = tpu.matmul %4, %5, %cst {dimension_numbers = #tpu.dot_dimension_numbers<[1], [0], [0], [1], [0, 0, 1, 1], [], []>} : vector<16x64xbf16>, vector<64x192xbf16>, vector<16x192xf32> -> vector<16x192xf32>
    %7 = arith.addf %3, %6 : vector<16x192xf32>
    %c0_6 = arith.constant 0 : index
    %c0_7 = arith.constant 0 : index
    %8 = vector.load %arg6[%c0_6, %c0_7] : memref<16x192xf32, #tpu.memory_space<vmem>>, vector<16x192xf32>
    tpu.vector_store %arg6[%c0_6, %c0_7], %7 {strides = array<i32>} : memref<16x192xf32, #tpu.memory_space<vmem>>, vector<16x192xf32>,
    %c0_i32_8 = arith.constant 0 : i32
    %9 = arith.cmpi eq, %arg2, %c0_i32_8 : i32
    %10 = arith.extui %9 : i1 to i32
    %c0_i32_9 = arith.constant 0 : i32
    %11 = arith.cmpi ne, %10, %c0_i32_9 : i32
    scf.if %11 {
      %c0_10 = arith.constant 0 : index
      %c0_11 = arith.constant 0 : index
      %12 = vector.load %arg6[%c0_10, %c0_11] : memref<16x192xf32, #tpu.memory_space<vmem>>, vector<16x192xf32>
      %13 = arith.truncf %12 : vector<16x192xf32> to vector<16x192xbf16>
      %c0_12 = arith.constant 0 : index
      %c0_13 = arith.constant 0 : index
      %14 = vector.load %arg5[%c0_12, %c0_13] : memref<16x192xbf16, #tpu.memory_space<vmem>>, vector<16x192xbf16>
      tpu.vector_store %arg5[%c0_12, %c0_13], %13 {strides = array<i32>} : memref<16x192xbf16, #tpu.memory_space<vmem>>, vector<16x192xbf16>,
    } else {
    }
    return
  }
  func.func @transform_0(%arg0: i32, %arg1: i32, %arg2: i32) -> (i32, i32) {
    %c0_i32 = arith.constant 0 : i32
    return %arg0, %arg2 : i32, i32
  }
  func.func @transform_1(%arg0: i32, %arg1: i32, %arg2: i32) -> (i32, i32) {
    %c0_i32 = arith.constant 0 : i32
    return %arg2, %arg1 : i32, i32
  }
  func.func @transform_2(%arg0: i32, %arg1: i32, %arg2: i32) -> (i32, i32) {
    %c0_i32 = arith.constant 0 : i32
    return %arg0, %arg1 : i32, i32
  }
}

</mosaic_0001>

<bundles_post_ra>
// kernel: tpu_custom_call.1
= control target key start
LH: loop header
LB: loop body
LE: loop exit
PB: predicated region body
PF: predicated region fallthrough
CT: control target
= control target key end

     0   :  { %7 = vsyncpa [#allocation4], 0  ;;  %s1014_s0 = inlined_call_operand.hbm [shape: bf16[32,64], index: 0, kind: input, shape index: {}]   ;;  %s1015_s1 = inlined_call_operand.hbm [shape: bf16[64,192], index: 1, kind: input, shape index: {}]   ;;  %s1016_s2 = inlined_call_operand.hbm [shape: bf16[32,192], index: 2, kind: output, shape index: {}]  }
   0x1   :  { %9 = vsyncpa [#allocation4 + $0x1], 0 }
   0x2   :  { %10 = vsyncpa [#allocation7], 0 }
   0x3   :  { %11 = vsyncpa [#allocation5], 0 }
   0x4   :  { %13 = vsyncpa [#allocation5 + $0x1], 0  ;;  %s789_s9 = smov 0   ;;  %s791_s10 = smov 0  }
   0x5   :  { %s793_s11 = smov 0   ;;  %s795_s12 = smov 0  }
   0x6   :  { %s797_s13 = smov 0   ;;  %s799_s14 = smov 0  }
   0x7 LB: > { %s488_s15 = sadd.s32 4294967295, %s761_s14   ;;  %s489_s16 = sadd.s32 4294967294, %s761_s14   ;;  %s761_s14 = sphi %s799_s14, %s19_s14   ;;  %s757_s13 = sphi %s797_s13, %s1040_s13   ;;  %s753_s12 = sphi %s795_s12, %s1039_s12   ;;  %s749_s11 = sphi %s793_s11, %s1038_s11   ;;  %s745_s10 = sphi %s791_s10, %s1037_s10   ;;  %s741_s9 = sphi %s789_s9, %s1036_s9  }
   0x8   : > { %p60_p0 = scmp.ne.s32.totalorder %s745_s10, %s741_s9  ;;  %p823_p1 = scmp.eq.s32.totalorder %s488_s15, 0 }
   0x9   : > { %p827_p2 = scmp.eq.s32.totalorder %s488_s15, 1  ;;  %p120_p3 = scmp.eq.s32.totalorder %s489_s16, 1 }
   0xa   : > { %s1021_s17 = scalar_select %p823_p1, 1, 0 }
   0xb   : > { %s1022_s18 = scalar_select %p827_p2, 1, 0 }
   0xc   : > { %p833_p4 = por %p823_p1, %p60_p0  ;;  %p490_p5 = scmp.ge.s32.totalorder %s761_s14, 1 }
   0xd   : > { %p838_p6 = por %p120_p3, %p60_p0  ;;  %p127_p7 = scmp.lt.s32.totalorder %s761_s14, 3 }
   0xe   : > { %s1023_s19 = scalar_select %p833_p4, 1, 0 }
   0xf   : > { %s1024_s20 = scalar_select %p838_p6, 1, 0 }
  0x10   : > { %p843_p8 = pnand %p490_p5, %p127_p7  ;;  %s763_s22 = smov [#allocation6]  }
  0x11   : > { %s145_s23 = sshll.u32 %s763_s22, 4  ;;  %s38_s25 = sadd.s32 1, %s757_s13  ;;  %s146_s23 = int_to_ptr.vmem [resolvable:$true] %s145_s23 }
  0x12   : > { %s1025_s21 = scalar_select %p843_p8, 1, 0 }
  0x13   : > { %p531_p9 = pneg %p843_p8  ;;  %s617_s28 = scalar_lea.hbm %s1015_s1, 1024 }
  0x14   : > { %p618_p12 = scmp.ne.s32.totalorder %s1015_s1, %s617_s28  ;;  %p624_p5 = scmp.lt.u32.totalorder %s617_s28, %s1015_s1 }
  0x15   : > { %p852_p11 = pnand %p531_p9, %p823_p1 }
  0x17   : > { %p619_p13 = pneg %p852_p11 }
  0x19   : > { %p620_p0 = pnand %p619_p13, %p618_p12 }
  0x1b   : > { %p621_p3 = pneg %p620_p0 }
  0x1d   : > { %p626_p7 = pnand %p624_p5, %p621_p3 }
  0x1f   : > { %629 = shalt.err (!%p626_p7)
}
  0x20   : > { %s630_s5 = scalar_lea.vmem %s146_s23, 1024  ;;  %p638_p1 = scmp.lt.s32.totalorder %s146_s23, %s146_s23 }
  0x21   : > { %p631_p9 = scmp.ne.s32.totalorder %s146_s23, %s630_s5  ;;  %p639_p4 = scmp.lt.s32.totalorder %s630_s5, %s630_s5 }
  0x23   : > { %p633_p10 = pnand %p631_p9, %p619_p13  ;;  %p640_p8 = por %p639_p4, %p638_p1 }
  0x25   : > { %p634_p6 = pneg %p633_p10 }
  0x27   : > { %p641_p2 = pnand %p640_p8, %p634_p6 }
  0x29   : > { %644 = shalt.err (!%p641_p2)
}
  0x2a   : > { %s764_s6 = smov 128   ;;  %s765_s7 = smov 8  }
  0x2b   : > { %534 = dma.hbm_to_vmem [thread:$0]  (!%p852_p11), %s1015_s1, 1024, %s146_s23, [#allocation7], %s764_s6, %s764_s6, %s765_s7  }
  0x2c   : > { %p40_p1 = scmp.ge.s32.totalorder %s38_s25, 2  ;;  %s47_s16 = sadd.s32 1, %s749_s11 }
  0x2d   : > { %p54_p2 = scmp.ne.s32.totalorder %s749_s11, %s745_s10  ;;  %p55_p4 = scmp.eq.s32.totalorder %s761_s14, 0 }
  0x2e   : > { %s1042_s25 = smov (%p40_p1, %s38_s25), 0  ;;  %p1028_p8 = scmp.ne.s32.totalorder %s1022_s18, 0 }
  0x2f   : > { %p879_p6 = por %p55_p4, %p54_p2  ;;  %s42_s24 = ssub.s32 %s757_s13, %s1042_s25 }
  0x30   : > { %p885_p10 = por %p1028_p8, %p54_p2  ;;  %p544_p12 = scmp.lt.s32.totalorder %s761_s14, 2 }
  0x31   : > { %p45_p11 = scmp.eq.s32.totalorder %s42_s24, 0  ;;  %s159_s23 = sand.u32 1, %s749_s11  }
  0x32   : > { %s493_s27 = sshll.u32 %s159_s23, 3  ;;  %s518_s29 = sshll.u32 %s757_s13, 7 }
  0x33   : > { %s894_s28 = scalar_select %p45_p11, %s749_s11, %s47_s16  }
  0x34   : > { %s900_s4 = scalar_lea.hbm %s1014_s0, %s518_s29  ;;  %s163_s18 = scalar_lea.vmem [#allocation3], %s493_s27 }
  0x35   : > { %s171_s5 = sshll.u32 %s163_s18, 4  ;;  %p906_p13 = pnand %p544_p12, %p879_p6  ;;  %s902_s5 = int_to_ptr.vmem [resolvable:$true] %s171_s5 }
  0x36   : > { %s910_s7 = scalar_lea.sflag [#allocation4], %s159_s23  ;;  %s645_s8 = scalar_lea.hbm %s900_s4, 128 }
  0x37   : > { %p646_p0 = scmp.ne.s32.totalorder %s900_s4, %s645_s8  ;;  %p647_p3 = pneg %p906_p13 }
  0x38   : > { %s650_s22 = scalar_lea.hbm %s1014_s0, 256  ;;  %p651_p9 = scmp.lt.u32.totalorder %s900_s4, %s1014_s0 }
  0x39   : > { %p648_p5 = pnand %p647_p3, %p646_p0  ;;  %p652_p1 = scmp.lt.u32.totalorder %s650_s22, %s645_s8 }
  0x3a   : > { %p654_p4 = scmp.lt.u32.totalorder %s645_s8, %s900_s4 }
  0x3b   : > { %p649_p7 = pneg %p648_p5  ;;  %p653_p2 = por %p652_p1, %p651_p9 }
  0x3d   : > { %p655_p6 = por %p654_p4, %p653_p2 }
  0x3f   : > { %p656_p8 = pnand %p655_p6, %p649_p7 }
  0x41   : > { %659 = shalt.err (!%p656_p8)
}
  0x42   : > { %s660_s23 = scalar_lea.vmem %s902_s5, 128  ;;  %s766_s29 = smov [#allocation3]  }
  0x43   : > { %p661_p12 = scmp.ne.s32.totalorder %s902_s5, %s660_s23  ;;  %s665_s30 = sshll.u32 %s766_s29, 4  ;;  %s666_s30 = int_to_ptr.vmem [resolvable:$false] %s665_s30 }
  0x44   : > { %s667_s3 = scalar_lea.vmem %s666_s30, 256  ;;  %p668_p5 = scmp.lt.s32.totalorder %s902_s5, %s666_s30 }
  0x45   : > { %p663_p11 = pnand %p661_p12, %p647_p3  ;;  %p669_p9 = scmp.lt.s32.totalorder %s667_s3, %s660_s23 }
  0x47   : > { %p664_p0 = pneg %p663_p11  ;;  %p670_p1 = por %p669_p9, %p668_p5 }
  0x49   : > { %p671_p2 = pnand %p670_p1, %p664_p0 }
  0x4b   : > { %674 = shalt.err (!%p671_p2)
}
  0x4c   : > { %s767_s18 = smov 64   ;;  %s768_s8 = smov 4  }
  0x4d   : > { %538 = dma.hbm_to_vmem [thread:$0]  (!%p906_p13), %s900_s4, 128, %s902_s5, %s910_s7, %s767_s18, %s767_s18, %s768_s8  }
  0x4e   : > { %p1031_p3 = scmp.ne.s32.totalorder %s1025_s21, 0 }
  0x4f   : > { %s941_s15 = sand.u32 (!%p1031_p3), 1, %s745_s10   ;;  %p1032_p7 = scmp.ne.s32.totalorder (!%p1031_p3), %s1023_s19, 0 }
  0x50   : > { %183 = sbr.rel (%p1031_p3) target bundleno = 351 (0x15f), region = 28  ;;  %s497_s16 = sshll.u32 (!%p1031_p3), %s941_s15, 3 }
  0x51   : > { %s186_s22 = scalar_lea.sflag (!%p1031_p3), [#allocation4], %s941_s15  ;;  %s189_s24 = scalar_lea.vmem (!%p1031_p3), [#allocation3], %s497_s16 }
  0x57   : > { %728 = dma.done.wait (%p1032_p7), %s186_s22, 128  }
  0x58   : > { %730 = vsyncadd (%p1032_p7), %s186_s22, 4294967168  ;;  %p1033_p4 = scmp.ne.s32.totalorder %s1021_s17, 0 }
  0x5a   : > { %732 = dma.done.wait (%p1033_p4), [#allocation7], 1024  }
  0x5b   : > { %734 = vsyncadd (%p1033_p4), [#allocation7], 4294966272  ;;  %vm225_vm0 = vcmask 523264   ;;  %v769_v0 = vmov 0   ;;  %v770_v1 = vmov 0.0   ;;  %v616_v10 = vld [vmem:[%s189_s24] sm:$0xff]  }
  0x5c   : > { %324 = vmatprep.mubr.bf16.mxu0 %v769_v0  ;;  %226 = vst.msk [vmem:[#allocation2 + $0x8] sm:$0xff] %vm225_vm0, %v770_v1  ;;  %228 = vst.msk [vmem:[#allocation2 + $0x18] sm:$0xff] %vm225_vm0, %v770_v1  ;;  %v604_v2 = vld [vmem:[#allocation6 + $0x4] ss:$8 sps:$4 sm:$0xff]   ;;  %v606_v3 = vld [vmem:[#allocation6] ss:$8 sps:$4 sm:$0xff]  }
  0x5d   : > { %292 = vmatprep.subr.bf16.mxu0 %v604_v2  ;;  %v607_v4 = vld [vmem:[#allocation6 + $0x14] ss:$8 sps:$4 sm:$0xff]   ;;  %v609_v5 = vld [vmem:[#allocation6 + $0x10] ss:$8 sps:$4 sm:$0xff]   ;;  %v610_v6 = vld [vmem:[#allocation6 + $0x24] ss:$8 sps:$4 sm:$0xff]  }
  0x5e   : > { %293 = vmatpush1.bf16.msra.mxu0 %v606_v3  ;;  %v612_v7 = vld [vmem:[#allocation6 + $0x20] ss:$8 sps:$4 sm:$0xff]   ;;  %v613_v8 = vld [vmem:[#allocation6 + $0x34] ss:$8 sps:$4 sm:$0xff]   ;;  %v615_v9 = vld [vmem:[#allocation6 + $0x30] ss:$8 sps:$4 sm:$0xff]  }
  0x5f   : > { %294 = vmatprep.subr.bf16.mxu0 %v607_v4  ;;  %s499_s17 = sshll.u32 %s941_s15, 4  ;;  %vm362_vm1 = vcmask 1043456   ;;  %vm363_vm2 = vcmask 523268   ;;  %s522_s19 = sshll.u32 %s753_s12, 8 }
  0x60   : > { %s213_s21 = scalar_lea.vmem [#allocation8], %s499_s17  ;;  %vm364_vm3 = vmor %vm363_vm2, %vm362_vm1  ;;  %s963_s7 = scalar_lea.hbm %s1016_s2, %s522_s19 }
  0x61   : > { %s384_s4 = sshll.u32 %s213_s21, 4  ;;  %s368_s12 = scalar_lea.sflag [#allocation5], %s941_s15  ;;  %s965_s4 = int_to_ptr.vmem [resolvable:$true] %s384_s4 }
  0x62   : > { %295 = vmatpush1.bf16.msra.mxu0 %v609_v5  ;;  %s675_s27 = scalar_lea.vmem %s965_s4, 256  ;;  %s771_s23 = smov [#allocation8]  }
  0x63   : > { %296 = vmatprep.subr.bf16.mxu0 %v610_v6  ;;  %v230_v11 = vld [vmem:[#allocation2 + $0x8] sm:$0xff]  ;;  %v232_v14 = vld [vmem:[#allocation2 + $0x18] sm:$0xff]  ;;  %p676_p13 = scmp.ne.s32.totalorder %s965_s4, %s675_s27  ;;  %s679_s29 = sshll.u32 %s771_s23, 4  ;;  %s680_s29 = int_to_ptr.vmem [resolvable:$false] %s679_s29 }
  0x64   : > { %s681_s30 = scalar_lea.vmem %s680_s29, 512  ;;  %p682_p12 = scmp.lt.s32.totalorder %s965_s4, %s680_s29 }
  0x65   : > { %p677_p6 = pnand %p676_p13, %p885_p10  ;;  %p683_p11 = scmp.lt.s32.totalorder %s681_s30, %s675_s27 }
  0x66   : > { %297 = vmatpush1.bf16.msra.mxu0 %v612_v7 }
  0x67   : > { %298 = vmatprep.subr.bf16.mxu0 %v613_v8  ;;  %p678_p8 = pneg %p677_p6  ;;  %p684_p0 = por %p683_p11, %p682_p12 }
  0x69   : > { %p685_p5 = pnand %p684_p0, %p678_p8 }
  0x6a   : > { %299 = vmatpush1.bf16.msra.mxu0 %v615_v9 }
  0x6d   : > { %509 = vmatmul.mubr.msk.bf16.vlgmr.msra.gmra.mrb[0].mxu0 %vm225_vm0, %v616_v10 }
 0x140   : > { %v326_v12 = vpop.f32.mrb[0].mxu0 }
 0x141   : > { %v328_v13 = vpop.f32.mrb[1].mxu0 }
 0x142   : > { %v336_v15 = vadd.f32 %v328_v13, %v230_v11  ;;  %v330_v16 = vpop.f32.mrb[2].mxu0 }
 0x143   : > { %v332_v17 = vpop.f32.mrb[3].mxu0 }
 0x144   : > { %340 = vst.msk [vmem:[#allocation2 + $0x8] sm:$0xff] %vm225_vm0, %v336_v15  ;;  %v338_v18 = vadd.f32 %v332_v17, %v232_v14 }
 0x146   : > { %342 = vst.msk [vmem:[#allocation2 + $0x18] sm:$0xff] %vm225_vm0, %v338_v18 }
 0x14b   : > { %v347_v19 = vld [vmem:[#allocation2 + $0x8] sm:$0xff] }
 0x14c   : > { %v519_v20 = vpack.c.bf16 %v347_v19, %v326_v12 }
 0x14d   : > { %v349_v21 = vld [vmem:[#allocation2 + $0x18] sm:$0xff] }
 0x14e   : > { %v520_v22 = vpack.c.bf16 %v349_v21, %v330_v16  ;;  %365 = vst.msk [vmem:[%s213_s21] sm:$0xff] %vm364_vm3, %v519_v20 }
 0x150   : > { %366 = vst.msk [vmem:[%s213_s21 + $0x8] sm:$0xff] %vm364_vm3, %v520_v22 }
 0x151   : > { %688 = shalt.err (!%p685_p5)
}
 0x152   : > { %s689_s3 = scalar_lea.hbm %s963_s7, 256  ;;  %s693_s16 = scalar_lea.hbm %s1016_s2, 512 }
 0x153   : > { %p690_p9 = scmp.ne.s32.totalorder %s963_s7, %s689_s3  ;;  %p694_p3 = scmp.lt.u32.totalorder %s963_s7, %s1016_s2 }
 0x154   : > { %p695_p7 = scmp.lt.u32.totalorder %s693_s16, %s689_s3  ;;  %p697_p13 = scmp.lt.u32.totalorder %s689_s3, %s963_s7 }
 0x155   : > { %p691_p1 = pnand %p690_p9, %p885_p10 }
 0x156   : > { %p696_p4 = por %p695_p7, %p694_p3 }
 0x157   : > { %p692_p2 = pneg %p691_p1 }
 0x158   : > { %p698_p6 = por %p697_p13, %p696_p4 }
 0x15a   : > { %p699_p8 = pnand %p698_p6, %p692_p2 }
 0x15c   : > { %702 = shalt.err (!%p699_p8)
}
 0x15d   : > { %s772_s17 = smov 128   ;;  %s773_s19 = smov 8  }
 0x15e   : > { %529 = dma.vmem_to_hbm [thread:$0]  (%p885_p10), %s965_s4, 256, %s963_s7, %s368_s12, %s772_s17, %s772_s17, %s773_s19  }
 0x15f PF: > { %s399_s21 = sand.u32 1, %s741_s9   ;;  %p1034_p12 = scmp.ne.s32.totalorder %s1024_s20, 0 }
 0x160   : > { %p1035_p11 = scmp.ge.s32.totalorder %s761_s14, 2  ;;  %s400_s5 = scalar_lea.sflag [#allocation5], %s399_s21 }
 0x162   : > { %p540_p0 = pnand %p1035_p11, %p1034_p12 }
 0x164   : > { %736 = dma.done.wait (!%p540_p0), %s400_s5, 256  }
 0x165   : > { %738 = vsyncadd (!%p540_p0), %s400_s5, 4294967040  ;;  %s19_s14 = sadd.s32 1, %s761_s14   ;;  %s1036_s9 = smov %s745_s10 }
 0x166   : > { %p16_p5 = scmp.ge.s32.totalorder %s19_s14, 4   ;;  %s1037_s10 = smov %s749_s11 }
 0x167   : > { %s1038_s11 = smov %s894_s28  ;;  %s1039_s12 = smov %s757_s13 }
 0x168   : > { %s1040_s13 = smov %s1042_s25  ;;  %18 = sbr.rel (!%p16_p5) target bundleno = 7 (0x7), region = 86 }
 0x16f   :  { %405 = vsyncpa [#allocation4], 1 }
 0x170   :  { %407 = vsyncpa [#allocation4 + $0x1], 1 }
 0x171   :  { %408 = vsyncpa [#allocation7], 1 }
 0x172   :  { %409 = vsyncpa [#allocation5], 1 }
 0x173   :  { %411 = vsyncpa [#allocation5 + $0x1], 1 }

</bundles_post_ra>
